<compile_context>
chip_gen: v7x
topology: tpu7x:2x2x1
jax: 0.10.0
libtpu: 0.0.40
codegen_flags: <defaults>
</compile_context>

<pallas_src>
import functools

import jax
import jax.numpy as jnp
from jax import lax
from jax.experimental import pallas as pl
from jax.experimental.pallas import tpu as pltpu

_LANE = 128
_VMEM_WORKSET_BUDGET = 8 * 1024 * 1024   # review: 4-8 MiB true working set


def _round_up(x, m):
    return -(-x // m) * m


def _sublane_multiple(dtype):
    # f32 -> 8, bf16 -> 16, int8/fp8 -> 32 sublanes per VMEM tile
    return max(8, 32 // jnp.dtype(dtype).itemsize)


def _num_proto_kernel(x_ref, o_ref, *, n, n_proto, fuse_mean):
    """x_ref: (P, TL) block - prototypes on sublanes, (sample,class) on lanes.

    Zeros the per-lane top-n prototypes.  With fuse_mean=True writes the mean
    over prototypes as a (1, TL) block instead of the full (P, TL) block.
    """
    v = x_ref[...].astype(jnp.float32)                    # (P, TL)
    p = v.shape[0]
    p_idx = lax.broadcasted_iota(jnp.int32, v.shape, 0)   # int32, no f32 cast
    sentinel = jnp.int32(p)
    neg_inf = jnp.float32(-jnp.inf)

    work = v
    if fuse_mean:
        acc = jnp.sum(v, axis=0, keepdims=True)           # (1, TL) f32
    else:
        out = v

    # n is small & static: n rounds of max-extraction.  Tie-break: lowest
    # prototype index wins (== a stable descending argsort).  NOTE: genuine
    # -inf / NaN inputs collide with the -inf knockout sentinel (degenerate
    # for the torch reference too, where 0 * -inf = nan).
    for _ in range(min(n, n_proto)):
        cur_max = jnp.max(work, axis=0, keepdims=True)                    # XLU
        first = jnp.min(jnp.where(work == cur_max, p_idx, sentinel),
                        axis=0, keepdims=True)                            # XLU
        pick = p_idx == first                              # one-hot over P / lane
        work = jnp.where(pick, neg_inf, work)
        if fuse_mean:
            acc = acc - cur_max                            # remove the picked value
        else:
            out = jnp.where(pick, 0.0, out)                # write zeros into a copy

    if fuse_mean:
        o_ref[...] = (acc * jnp.float32(1.0 / n_proto)).astype(o_ref.dtype)
    else:
        o_ref[...] = out.astype(o_ref.dtype)


def _plan_lane_tiling(P, L, in_dtype, out_dtype, fuse_mean, lane_block):
    """Pick the lane-tile width from the true padded-VMEM working set."""
    in_b = jnp.dtype(in_dtype).itemsize
    out_b = jnp.dtype(out_dtype).itemsize
    p_in = _round_up(P, _sublane_multiple(in_dtype))
    p_out = 8 if fuse_mean else _round_up(P, _sublane_multiple(out_dtype))
    p_f32 = _round_up(P, 8)
    # True VMEM bytes per lane column: double-buffered input + output blocks
    # plus ~4 live f32/i32 tile-sized values in the kernel body
    # (work, p_idx, out/acc, transient temporaries).
    bytes_per_lane = 2 * p_in * in_b + 2 * p_out * out_b + 4 * p_f32 * 4
    l_ceil = _round_up(max(L, 1), _LANE)

    if lane_block is None:
        tl = max(_LANE, (_VMEM_WORKSET_BUDGET // bytes_per_lane) // _LANE * _LANE)
        tl = min(tl, l_ceil)                 # never force a split for small inputs
        n_blocks = pl.cdiv(L, tl)
        if n_blocks > 1 and n_blocks % 2 == 1:
            # Prefer an even step count so v7x's two TensorCores split evenly.
            tl_even = min(l_ceil, max(_LANE, _round_up(pl.cdiv(L, n_blocks + 1), _LANE)))
            if pl.cdiv(L, tl_even) % 2 == 0:
                tl = tl_even
                n_blocks = pl.cdiv(L, tl)
    else:
        tl = min(l_ceil, _round_up(int(lane_block), _LANE))
        n_blocks = pl.cdiv(L, tl)

    vmem_need = bytes_per_lane * tl
    vmem_limit = int(min(64 << 20, max(vmem_need + (4 << 20), 16 << 20)))
    return tl, n_blocks, vmem_limit


def num_proto_loss(contributions, n=4, reduce=False, lane_block=None):
    """contributions: (S, P, C) -> (S, P, C), or (S, C) if reduce=True."""
    S, P, C = map(int, contributions.shape)
    dt = contributions.dtype
    L = S * C

    # Lane-dense repack: reduction axis (prototypes) on sublanes, the S*C
    # (sample, class) pairs on lanes.  One XLA transpose each way; ideally the
    # producer emits this layout directly.
    x2 = jnp.transpose(contributions, (1, 0, 2)).reshape(P, L)

    tl, n_blocks, vmem_limit = _plan_lane_tiling(P, L, dt, dt, reduce, lane_block)
    L_pad = n_blocks * tl
    if L_pad != L:
        x2 = jnp.pad(x2, ((0, 0), (0, L_pad - L)))

    out_rows = 1 if reduce else P
    out = pl.pallas_call(
        functools.partial(_num_proto_kernel, n=int(n), n_proto=P,
                          fuse_mean=bool(reduce)),
        out_shape=jax.ShapeDtypeStruct((out_rows, L_pad), dt),
        grid=(n_blocks,),
        in_specs=[pl.BlockSpec((P, tl), lambda i: (0, i))],
        out_specs=pl.BlockSpec((out_rows, tl), lambda i: (0, i)),
        compiler_params=pltpu.CompilerParams(
            dimension_semantics=("parallel",),
            vmem_limit_bytes=vmem_limit),
    )(x2)

    if reduce:
        return out[0, :L].reshape(S, C)
    return jnp.transpose(out[:, :L].reshape(P, S, C), (1, 0, 2))


def _reference(contributions, n=4, reduce=False):
    """Pure-JAX re-implementation of the torch forward (stable tie-break)."""
    S, P, C = contributions.shape
    order = jnp.argsort(-contributions, axis=1)          # stable descending
    top = order[:, :min(n, P), :]                        # (S, n, C)
    sel = jnp.any(top[:, :, None, :] == jnp.arange(P)[None, None, :, None],
                  axis=1)                                # (S, P, C)
    mask = jnp.where(sel, 0.0, 1.0).astype(contributions.dtype)
    loss = contributions * mask
    if reduce:
        return loss.mean(axis=1)
    return loss


# TODO(synk): `mask.requires_grad = True` in the torch module is autograd-only
# and has no forward-pass equivalent here.

if __name__ == "__main__":
    key = jax.random.PRNGKey(0)
    n = 4

    # Primary case: single lane-dense tile (S*C == 128), no forced grid split.
    S, P, C = 8, 32, 16          # n_samples, n_proto, n_class
    contributions = jax.random.normal(key, (S, P, C), dtype=jnp.float32)

    out = jax.block_until_ready(num_proto_loss(contributions, n=n, reduce=False))
    ref = _reference(contributions, n=n, reduce=False)
    assert out.shape == (S, P, C)
    assert jnp.allclose(out, ref, rtol=1e-6, atol=1e-6)

    out_r = jax.block_until_ready(num_proto_loss(contributions, n=n, reduce=True))
    ref_r = _reference(contributions, n=n, reduce=True)
    assert out_r.shape == (S, C)
    assert jnp.allclose(out_r, ref_r, rtol=1e-4, atol=1e-5)

    # Secondary case: multi-block grid + lane padding (S*C = 800 -> 4 x 256).
    key2, = jax.random.split(key, 1)
    S2, P2, C2 = 25, 16, 32
    contributions2 = jax.random.normal(key2, (S2, P2, C2), dtype=jnp.float32)

    out2 = jax.block_until_ready(
        num_proto_loss(contributions2, n=n, reduce=False, lane_block=256))
    assert out2.shape == (S2, P2, C2)
    assert jnp.allclose(out2, _reference(contributions2, n=n), rtol=1e-6, atol=1e-6)

    out2_r = jax.block_until_ready(
        num_proto_loss(contributions2, n=n, reduce=True, lane_block=256))
    assert out2_r.shape == (S2, C2)
    assert jnp.allclose(out2_r, _reference(contributions2, n=n, reduce=True),
                        rtol=1e-4, atol=1e-5)

    print("KERNEL_OK")
</pallas_src>

<mosaic_0001>
module attributes {stable_mosaic.version = 11 : i64} {
  func.func @_num_proto_kernel(%arg0: i32, %arg1: memref<32x128xf32, #tpu.memory_space<vmem>>, %arg2: memref<32x128xf32, #tpu.memory_space<vmem>>) attributes {dimension_semantics = [#tpu.dimension_semantics<parallel>], iteration_bounds = array<i64: 1>, scalar_prefetch = 0 : i64, scratch_operands = 0 : i64, tpu.core_type = #tpu.core_type<tc>, window_params = [{transform_indices = @transform_0, window_bounds = array<i64: 32, 128>}, {transform_indices = @transform_1, window_bounds = array<i64: 32, 128>}]} {
    %c0 = arith.constant 0 : index
    %c0_0 = arith.constant 0 : index
    %0 = vector.load %arg1[%c0, %c0_0] : memref<32x128xf32, #tpu.memory_space<vmem>>, vector<32x128xf32>
    %1 = tpu.iota {dimensions = array<i32: 0>} : vector<32x128xi32>
    %cst = arith.constant dense<0xFF800000> : vector<128xf32>
    %2 = vector.multi_reduction <maximumf>, %0, %cst [0] : vector<32x128xf32> to vector<128xf32>
    %3 = vector.shape_cast %2 : vector<128xf32> to vector<1x128xf32>
    %4 = vector.broadcast %3 : vector<1x128xf32> to vector<32x128xf32>
    %5 = arith.cmpf oeq, %0, %4 : vector<32x128xf32>
    %c32_i32 = arith.constant 32 : i32
    %6 = vector.broadcast %c32_i32 : i32 to vector<32x128xi32>
    %7 = arith.select %5, %1, %6 : vector<32x128xi1>, vector<32x128xi32>
    %cst_1 = arith.constant dense<2147483647> : vector<128xi32>
    %8 = vector.multi_reduction <minsi>, %7, %cst_1 [0] : vector<32x128xi32> to vector<128xi32>
    %9 = vector.shape_cast %8 : vector<128xi32> to vector<1x128xi32>
    %10 = vector.broadcast %9 : vector<1x128xi32> to vector<32x128xi32>
    %11 = arith.cmpi eq, %1, %10 : vector<32x128xi32>
    %cst_2 = arith.constant 0xFF800000 : f32
    %12 = vector.broadcast %cst_2 : f32 to vector<32x128xf32>
    %13 = arith.select %11, %12, %0 : vector<32x128xi1>, vector<32x128xf32>
    %cst_3 = arith.constant 0.000000e+00 : f32
    %14 = vector.broadcast %cst_3 : f32 to vector<32x128xf32>
    %15 = arith.select %11, %14, %0 : vector<32x128xi1>, vector<32x128xf32>
    %cst_4 = arith.constant dense<0xFF800000> : vector<128xf32>
    %16 = vector.multi_reduction <maximumf>, %13, %cst_4 [0] : vector<32x128xf32> to vector<128xf32>
    %17 = vector.shape_cast %16 : vector<128xf32> to vector<1x128xf32>
    %18 = vector.broadcast %17 : vector<1x128xf32> to vector<32x128xf32>
    %19 = arith.cmpf oeq, %13, %18 : vector<32x128xf32>
    %c32_i32_5 = arith.constant 32 : i32
    %20 = vector.broadcast %c32_i32_5 : i32 to vector<32x128xi32>
    %21 = arith.select %19, %1, %20 : vector<32x128xi1>, vector<32x128xi32>
    %cst_6 = arith.constant dense<2147483647> : vector<128xi32>
    %22 = vector.multi_reduction <minsi>, %21, %cst_6 [0] : vector<32x128xi32> to vector<128xi32>
    %23 = vector.shape_cast %22 : vector<128xi32> to vector<1x128xi32>
    %24 = vector.broadcast %23 : vector<1x128xi32> to vector<32x128xi32>
    %25 = arith.cmpi eq, %1, %24 : vector<32x128xi32>
    %cst_7 = arith.constant 0xFF800000 : f32
    %26 = vector.broadcast %cst_7 : f32 to vector<32x128xf32>
    %27 = arith.select %25, %26, %13 : vector<32x128xi1>, vector<32x128xf32>
    %cst_8 = arith.constant 0.000000e+00 : f32
    %28 = vector.broadcast %cst_8 : f32 to vector<32x128xf32>
    %29 = arith.select %25, %28, %15 : vector<32x128xi1>, vector<32x128xf32>
    %cst_9 = arith.constant dense<0xFF800000> : vector<128xf32>
    %30 = vector.multi_reduction <maximumf>, %27, %cst_9 [0] : vector<32x128xf32> to vector<128xf32>
    %31 = vector.shape_cast %30 : vector<128xf32> to vector<1x128xf32>
    %32 = vector.broadcast %31 : vector<1x128xf32> to vector<32x128xf32>
    %33 = arith.cmpf oeq, %27, %32 : vector<32x128xf32>
    %c32_i32_10 = arith.constant 32 : i32
    %34 = vector.broadcast %c32_i32_10 : i32 to vector<32x128xi32>
    %35 = arith.select %33, %1, %34 : vector<32x128xi1>, vector<32x128xi32>
    %cst_11 = arith.constant dense<2147483647> : vector<128xi32>
    %36 = vector.multi_reduction <minsi>, %35, %cst_11 [0] : vector<32x128xi32> to vector<128xi32>
    %37 = vector.shape_cast %36 : vector<128xi32> to vector<1x128xi32>
    %38 = vector.broadcast %37 : vector<1x128xi32> to vector<32x128xi32>
    %39 = arith.cmpi eq, %1, %38 : vector<32x128xi32>
    %cst_12 = arith.constant 0xFF800000 : f32
    %40 = vector.broadcast %cst_12 : f32 to vector<32x128xf32>
    %41 = arith.select %39, %40, %27 : vector<32x128xi1>, vector<32x128xf32>
    %cst_13 = arith.constant 0.000000e+00 : f32
    %42 = vector.broadcast %cst_13 : f32 to vector<32x128xf32>
    %43 = arith.select %39, %42, %29 : vector<32x128xi1>, vector<32x128xf32>
    %cst_14 = arith.constant dense<0xFF800000> : vector<128xf32>
    %44 = vector.multi_reduction <maximumf>, %41, %cst_14 [0] : vector<32x128xf32> to vector<128xf32>
    %45 = vector.shape_cast %44 : vector<128xf32> to vector<1x128xf32>
    %46 = vector.broadcast %45 : vector<1x128xf32> to vector<32x128xf32>
    %47 = arith.cmpf oeq, %41, %46 : vector<32x128xf32>
    %c32_i32_15 = arith.constant 32 : i32
    %48 = vector.broadcast %c32_i32_15 : i32 to vector<32x128xi32>
    %49 = arith.select %47, %1, %48 : vector<32x128xi1>, vector<32x128xi32>
    %cst_16 = arith.constant dense<2147483647> : vector<128xi32>
    %50 = vector.multi_reduction <minsi>, %49, %cst_16 [0] : vector<32x128xi32> to vector<128xi32>
    %51 = vector.shape_cast %50 : vector<128xi32> to vector<1x128xi32>
    %52 = vector.broadcast %51 : vector<1x128xi32> to vector<32x128xi32>
    %53 = arith.cmpi eq, %1, %52 : vector<32x128xi32>
    %cst_17 = arith.constant 0.000000e+00 : f32
    %54 = vector.broadcast %cst_17 : f32 to vector<32x128xf32>
    %55 = arith.select %53, %54, %43 : vector<32x128xi1>, vector<32x128xf32>
    %c0_18 = arith.constant 0 : index
    %c0_19 = arith.constant 0 : index
    %56 = vector.load %arg2[%c0_18, %c0_19] : memref<32x128xf32, #tpu.memory_space<vmem>>, vector<32x128xf32>
    tpu.vector_store %arg2[%c0_18, %c0_19], %55 {strides = array<i32>} : memref<32x128xf32, #tpu.memory_space<vmem>>, vector<32x128xf32>,
    return
  }
  func.func @transform_0(%arg0: i32) -> (i32, i32) {
    %c0_i32 = arith.constant 0 : i32
    %c0_i32_0 = arith.constant 0 : i32
    return %c0_i32, %arg0 : i32, i32
  }
  func.func @transform_1(%arg0: i32) -> (i32, i32) {
    %c0_i32 = arith.constant 0 : i32
    %c0_i32_0 = arith.constant 0 : i32
    return %c0_i32, %arg0 : i32, i32
  }
}

</mosaic_0001>

<bundles_post_ra>
// kernel: tpu_custom_call.1
= control target key start
LH: loop header
LB: loop body
LE: loop exit
PB: predicated region body
PF: predicated region fallthrough
CT: control target
= control target key end

     0   :  { %6 = vsyncpa [#allocation3], 0  ;;  %s392_s0 = inlined_call_operand.hbm [shape: f32[32,128], index: 0, kind: input, shape index: {}]   ;;  %s393_s1 = inlined_call_operand.hbm [shape: f32[32,128], index: 1, kind: output, shape index: {}]  }
   0x1   :  { %7 = vsyncpa [#allocation4], 0  ;;  %s277_s6 = smov [#allocation2]   ;;  %s229_s10 = scalar_lea.hbm %s392_s0, 512 }
   0x2   :  { %s13_s7 = sshll.u32 %s277_s6, 4  ;;  %p230_p0 = scmp.ne.s32.totalorder %s392_s0, %s229_s10  ;;  %s14_s7 = int_to_ptr.vmem [resolvable:$true] %s13_s7 }
   0x3   :  { %p233_p1 = scmp.lt.u32.totalorder %s229_s10, %s392_s0 }
   0x5   :  { %p235_p2 = pnand %p233_p1, %p230_p0 }
   0x7   :  { %238 = shalt.err (!%p235_p2)
}
   0x8   :  { %s239_s15 = scalar_lea.vmem %s14_s7, 512  ;;  %p244_p4 = scmp.lt.s32.totalorder %s14_s7, %s14_s7 }
   0x9   :  { %p240_p3 = scmp.ne.s32.totalorder %s14_s7, %s239_s15  ;;  %p245_p5 = scmp.lt.s32.totalorder %s239_s15, %s239_s15 }
   0xb   :  { %p246_p6 = por %p245_p5, %p244_p4 }
   0xd   :  { %p247_p7 = pnand %p246_p6, %p240_p3 }
   0xf   :  { %250 = shalt.err (!%p247_p7)
}
  0x10   :  { %s278_s16 = smov 128   ;;  %s279_s17 = smov 8  }
  0x11   :  { %19 = dma.hbm_to_vmem [thread:$0]  %s392_s0, 512, %s14_s7, [#allocation3], %s278_s16, %s278_s16, %s279_s17  }
  0x12   :  { %273 = dma.done.wait [#allocation3], 512  }
  0x13   :  { %274 = vsyncadd [#allocation3], 4294966784  ;;  %v23_v0 = vld [vmem:[#allocation2] sm:$0xff]  ;;  %v24_v1 = vld [vmem:[#allocation2 + $0x8] sm:$0xff]  ;;  %v27_v8 = vlaneseq  ;;  %s280_s0 = smov [#allocation5]  }
  0x14   :  { %v25_v2 = vld [vmem:[#allocation2 + $0x10] sm:$0xff]  ;;  %v26_v3 = vld [vmem:[#allocation2 + $0x18] sm:$0xff]  ;;  %v32_v4 = vmax.f32 %v23_v0, %v24_v1  ;;  %s213_s20 = sshll.u32 %s280_s0, 4  ;;  %s214_s20 = int_to_ptr.vmem [resolvable:$true] %s213_s20 }
  0x15   :  { %v33_v5 = vmax.f32 %v25_v2, %v26_v3  ;;  %v306_v11 = vshrl.u32 %v27_v8, 7  ;;  %s251_s21 = scalar_lea.vmem %s214_s20, 512  ;;  %p256_p9 = scmp.lt.s32.totalorder %s214_s20, %s214_s20 }
  0x16   :  { %p252_p8 = scmp.ne.s32.totalorder %s214_s20, %s251_s21  ;;  %p257_p10 = scmp.lt.s32.totalorder %s251_s21, %s251_s21 }
  0x17   :  { %v34_v6 = vmax.f32 %v32_v4, %v33_v5  ;;  %v309_v14 = vadd.s32 8, %v306_v11  ;;  %v312_v15 = vadd.s32 16, %v306_v11  ;;  %v315_v16 = vadd.s32 24, %v306_v11 }
  0x18   :  { %p258_p11 = por %p257_p10, %p256_p9 }
  0x19   :  { %v35_v7 = vrot.slane %v34_v6, 4 }
  0x1a   :  { %p259_p12 = pnand %p258_p11, %p252_p8 }
  0x1b   :  { %v36_v9 = vmax.f32 %v34_v6, %v35_v7 }
  0x1d   :  { %v37_v10 = vrot.slane %v36_v9, 2 }
  0x1f   :  { %v38_v12 = vmax.f32 %v36_v9, %v37_v10 }
  0x21   :  { %v39_v13 = vrot.slane %v38_v12, 1 }
  0x23   :  { %v40_v17 = vmax.f32 %v38_v12, %v39_v13 }
  0x25   :  { %vm41_vm0 = vcmp.eq.f32.partialorder %v23_v0, %v40_v17  ;;  %vm42_vm1 = vcmp.eq.f32.partialorder %v24_v1, %v40_v17  ;;  %vm43_vm2 = vcmp.eq.f32.partialorder %v25_v2, %v40_v17  ;;  %vm44_vm3 = vcmp.eq.f32.partialorder %v26_v3, %v40_v17 }
  0x26   :  { %v45_v18 = vsel %vm41_vm0, %v306_v11, 32  ;;  %v46_v19 = vsel %vm42_vm1, %v309_v14, 32  ;;  %v47_v20 = vsel %vm43_vm2, %v312_v15, 32  ;;  %v48_v21 = vsel %vm44_vm3, %v315_v16, 32 }
  0x27   :  { %vm49_vm4 = vcmp.lt.s32.totalorder %v45_v18, %v46_v19  ;;  %vm51_vm5 = vcmp.lt.s32.totalorder %v47_v20, %v48_v21 }
  0x28   :  { %v50_v22 = vsel %vm49_vm4, %v45_v18, %v46_v19  ;;  %v52_v23 = vsel %vm51_vm5, %v47_v20, %v48_v21 }
  0x29   :  { %vm53_vm6 = vcmp.lt.s32.totalorder %v50_v22, %v52_v23 }
  0x2a   :  { %v54_v24 = vsel %vm53_vm6, %v50_v22, %v52_v23 }
  0x2b   :  { %v55_v25 = vrot.slane %v54_v24, 4 }
  0x2d   :  { %vm56_vm7 = vcmp.lt.s32.totalorder %v54_v24, %v55_v25 }
  0x2e   :  { %v57_v26 = vsel %vm56_vm7, %v54_v24, %v55_v25 }
  0x2f   :  { %v58_v27 = vrot.slane %v57_v26, 2 }
  0x31   :  { %vm59_vm8 = vcmp.lt.s32.totalorder %v57_v26, %v58_v27 }
  0x32   :  { %v60_v28 = vsel %vm59_vm8, %v57_v26, %v58_v27 }
  0x33   :  { %v61_v29 = vrot.slane %v60_v28, 1 }
  0x35   :  { %vm62_vm9 = vcmp.lt.s32.totalorder %v60_v28, %v61_v29 }
  0x36   :  { %v63_v30 = vsel %vm62_vm9, %v60_v28, %v61_v29 }
  0x37   :  { %vm64_vm10 = vcmp.eq.s32.totalorder %v306_v11, %v63_v30  ;;  %vm65_vm11 = vcmp.eq.s32.totalorder %v309_v14, %v63_v30  ;;  %vm66_vm12 = vcmp.eq.s32.totalorder %v312_v15, %v63_v30  ;;  %vm67_vm13 = vcmp.eq.s32.totalorder %v315_v16, %v63_v30 }
  0x38   :  { %v68_v31 = vsel %vm64_vm10, -inf, %v23_v0  ;;  %v69_v32 = vsel %vm65_vm11, -inf, %v24_v1  ;;  %v70_v33 = vsel %vm66_vm12, -inf, %v25_v2  ;;  %v71_v34 = vsel %vm67_vm13, -inf, %v26_v3 }
  0x39   :  { %v72_v35 = vsel %vm64_vm10, 0.0, %v23_v0  ;;  %v76_v36 = vmax.f32 %v68_v31, %v69_v32  ;;  %v77_v37 = vmax.f32 %v70_v33, %v71_v34  ;;  %v73_v38 = vsel %vm65_vm11, 0.0, %v24_v1 }
  0x3a   :  { %v74_v39 = vsel %vm66_vm12, 0.0, %v25_v2  ;;  %v75_v40 = vsel %vm67_vm13, 0.0, %v26_v3 }
  0x3b   :  { %v78_v41 = vmax.f32 %v76_v36, %v77_v37 }
  0x3d   :  { %v79_v42 = vrot.slane %v78_v41, 4 }
  0x3f   :  { %v80_v43 = vmax.f32 %v78_v41, %v79_v42 }
  0x41   :  { %v81_v44 = vrot.slane %v80_v43, 2 }
  0x43   :  { %v82_v45 = vmax.f32 %v80_v43, %v81_v44 }
  0x45   :  { %v83_v46 = vrot.slane %v82_v45, 1 }
  0x47   :  { %v84_v47 = vmax.f32 %v82_v45, %v83_v46 }
  0x49   :  { %vm85_vm14 = vcmp.eq.f32.partialorder %v68_v31, %v84_v47  ;;  %vm86_vm15 = vcmp.eq.f32.partialorder %v69_v32, %v84_v47  ;;  %vm87_vm0 = vcmp.eq.f32.partialorder %v70_v33, %v84_v47  ;;  %vm88_vm1 = vcmp.eq.f32.partialorder %v71_v34, %v84_v47 }
  0x4a   :  { %v89_v48 = vsel %vm85_vm14, %v306_v11, 32  ;;  %v90_v49 = vsel %vm86_vm15, %v309_v14, 32  ;;  %v91_v50 = vsel %vm87_vm0, %v312_v15, 32  ;;  %v92_v51 = vsel %vm88_vm1, %v315_v16, 32 }
  0x4b   :  { %vm93_vm2 = vcmp.lt.s32.totalorder %v89_v48, %v90_v49  ;;  %vm95_vm3 = vcmp.lt.s32.totalorder %v91_v50, %v92_v51 }
  0x4c   :  { %v94_v52 = vsel %vm93_vm2, %v89_v48, %v90_v49  ;;  %v96_v53 = vsel %vm95_vm3, %v91_v50, %v92_v51 }
  0x4d   :  { %vm97_vm4 = vcmp.lt.s32.totalorder %v94_v52, %v96_v53 }
  0x4e   :  { %v98_v54 = vsel %vm97_vm4, %v94_v52, %v96_v53 }
  0x4f   :  { %v99_v55 = vrot.slane %v98_v54, 4 }
  0x51   :  { %vm100_vm5 = vcmp.lt.s32.totalorder %v98_v54, %v99_v55 }
  0x52   :  { %v101_v56 = vsel %vm100_vm5, %v98_v54, %v99_v55 }
  0x53   :  { %v102_v57 = vrot.slane %v101_v56, 2 }
  0x55   :  { %vm103_vm6 = vcmp.lt.s32.totalorder %v101_v56, %v102_v57 }
  0x56   :  { %v104_v58 = vsel %vm103_vm6, %v101_v56, %v102_v57 }
  0x57   :  { %v105_v59 = vrot.slane %v104_v58, 1 }
  0x59   :  { %vm106_vm7 = vcmp.lt.s32.totalorder %v104_v58, %v105_v59 }
  0x5a   :  { %v107_v60 = vsel %vm106_vm7, %v104_v58, %v105_v59 }
  0x5b   :  { %vm108_vm8 = vcmp.eq.s32.totalorder %v306_v11, %v107_v60  ;;  %vm109_vm9 = vcmp.eq.s32.totalorder %v309_v14, %v107_v60  ;;  %vm110_vm10 = vcmp.eq.s32.totalorder %v312_v15, %v107_v60  ;;  %vm111_vm11 = vcmp.eq.s32.totalorder %v315_v16, %v107_v60 }
  0x5c   :  { %v112_v61 = vsel %vm108_vm8, -inf, %v68_v31  ;;  %v113_v62 = vsel %vm109_vm9, -inf, %v69_v32  ;;  %v114_v63 = vsel %vm110_vm10, -inf, %v70_v33  ;;  %v115_v0 = vsel %vm111_vm11, -inf, %v71_v34 }
  0x5d   :  { %v333_v1 = vsel %vm108_vm8, 0.0, %v72_v35  ;;  %v120_v2 = vmax.f32 %v112_v61, %v113_v62  ;;  %v121_v3 = vmax.f32 %v114_v63, %v115_v0  ;;  %v335_v4 = vsel %vm109_vm9, 0.0, %v73_v38 }
  0x5e   :  { %v337_v5 = vsel %vm110_vm10, 0.0, %v74_v39  ;;  %v339_v6 = vsel %vm111_vm11, 0.0, %v75_v40 }
  0x5f   :  { %v122_v7 = vmax.f32 %v120_v2, %v121_v3 }
  0x61   :  { %v123_v8 = vrot.slane %v122_v7, 4 }
  0x63   :  { %v124_v9 = vmax.f32 %v122_v7, %v123_v8 }
  0x65   :  { %v125_v10 = vrot.slane %v124_v9, 2 }
  0x67   :  { %v126_v12 = vmax.f32 %v124_v9, %v125_v10 }
  0x69   :  { %v127_v13 = vrot.slane %v126_v12, 1 }
  0x6b   :  { %v128_v17 = vmax.f32 %v126_v12, %v127_v13 }
  0x6d   :  { %vm129_vm12 = vcmp.eq.f32.partialorder %v112_v61, %v128_v17  ;;  %vm130_vm13 = vcmp.eq.f32.partialorder %v113_v62, %v128_v17  ;;  %vm131_vm14 = vcmp.eq.f32.partialorder %v114_v63, %v128_v17  ;;  %vm132_vm15 = vcmp.eq.f32.partialorder %v115_v0, %v128_v17 }
  0x6e   :  { %v133_v18 = vsel %vm129_vm12, %v306_v11, 32  ;;  %v134_v19 = vsel %vm130_vm13, %v309_v14, 32  ;;  %v135_v20 = vsel %vm131_vm14, %v312_v15, 32  ;;  %v136_v21 = vsel %vm132_vm15, %v315_v16, 32 }
  0x6f   :  { %vm137_vm0 = vcmp.lt.s32.totalorder %v133_v18, %v134_v19  ;;  %vm139_vm1 = vcmp.lt.s32.totalorder %v135_v20, %v136_v21 }
  0x70   :  { %v138_v22 = vsel %vm137_vm0, %v133_v18, %v134_v19  ;;  %v140_v23 = vsel %vm139_vm1, %v135_v20, %v136_v21 }
  0x71   :  { %vm141_vm2 = vcmp.lt.s32.totalorder %v138_v22, %v140_v23 }
  0x72   :  { %v142_v24 = vsel %vm141_vm2, %v138_v22, %v140_v23 }
  0x73   :  { %v143_v25 = vrot.slane %v142_v24, 4 }
  0x75   :  { %vm144_vm3 = vcmp.lt.s32.totalorder %v142_v24, %v143_v25 }
  0x76   :  { %v145_v26 = vsel %vm144_vm3, %v142_v24, %v143_v25 }
  0x77   :  { %v146_v27 = vrot.slane %v145_v26, 2 }
  0x79   :  { %vm147_vm4 = vcmp.lt.s32.totalorder %v145_v26, %v146_v27 }
  0x7a   :  { %v148_v28 = vsel %vm147_vm4, %v145_v26, %v146_v27 }
  0x7b   :  { %v149_v29 = vrot.slane %v148_v28, 1 }
  0x7d   :  { %vm150_vm5 = vcmp.lt.s32.totalorder %v148_v28, %v149_v29 }
  0x7e   :  { %v151_v30 = vsel %vm150_vm5, %v148_v28, %v149_v29 }
  0x7f   :  { %vm152_vm6 = vcmp.eq.s32.totalorder %v306_v11, %v151_v30  ;;  %vm153_vm7 = vcmp.eq.s32.totalorder %v309_v14, %v151_v30  ;;  %vm154_vm8 = vcmp.eq.s32.totalorder %v312_v15, %v151_v30  ;;  %vm155_vm9 = vcmp.eq.s32.totalorder %v315_v16, %v151_v30 }
  0x80   :  { %v156_v31 = vsel %vm152_vm6, -inf, %v112_v61  ;;  %v157_v32 = vsel %vm153_vm7, -inf, %v113_v62  ;;  %v158_v33 = vsel %vm154_vm8, -inf, %v114_v63  ;;  %v159_v34 = vsel %vm155_vm9, -inf, %v115_v0 }
  0x81   :  { %v164_v35 = vmax.f32 %v156_v31, %v157_v32  ;;  %v165_v36 = vmax.f32 %v158_v33, %v159_v34  ;;  %v160_v56 = vsel %vm152_vm6, 0.0, %v333_v1  ;;  %v161_v57 = vsel %vm153_vm7, 0.0, %v335_v4 }
  0x82   :  { %v162_v58 = vsel %vm154_vm8, 0.0, %v337_v5  ;;  %v163_v59 = vsel %vm155_vm9, 0.0, %v339_v6 }
  0x83   :  { %v166_v37 = vmax.f32 %v164_v35, %v165_v36 }
  0x85   :  { %v167_v38 = vrot.slane %v166_v37, 4 }
  0x87   :  { %v168_v39 = vmax.f32 %v166_v37, %v167_v38 }
  0x89   :  { %v169_v40 = vrot.slane %v168_v39, 2 }
  0x8b   :  { %v170_v41 = vmax.f32 %v168_v39, %v169_v40 }
  0x8d   :  { %v171_v42 = vrot.slane %v170_v41, 1 }
  0x8f   :  { %v172_v43 = vmax.f32 %v170_v41, %v171_v42 }
  0x91   :  { %vm173_vm10 = vcmp.eq.f32.partialorder %v156_v31, %v172_v43  ;;  %vm174_vm11 = vcmp.eq.f32.partialorder %v157_v32, %v172_v43  ;;  %vm175_vm12 = vcmp.eq.f32.partialorder %v158_v33, %v172_v43  ;;  %vm176_vm13 = vcmp.eq.f32.partialorder %v159_v34, %v172_v43 }
  0x92   :  { %v177_v44 = vsel %vm173_vm10, %v306_v11, 32  ;;  %v178_v45 = vsel %vm174_vm11, %v309_v14, 32  ;;  %v179_v46 = vsel %vm175_vm12, %v312_v15, 32  ;;  %v180_v47 = vsel %vm176_vm13, %v315_v16, 32 }
  0x93   :  { %vm181_vm14 = vcmp.lt.s32.totalorder %v177_v44, %v178_v45  ;;  %vm183_vm15 = vcmp.lt.s32.totalorder %v179_v46, %v180_v47 }
  0x94   :  { %v182_v48 = vsel %vm181_vm14, %v177_v44, %v178_v45  ;;  %v184_v49 = vsel %vm183_vm15, %v179_v46, %v180_v47 }
  0x95   :  { %vm185_vm0 = vcmp.lt.s32.totalorder %v182_v48, %v184_v49 }
  0x96   :  { %v186_v50 = vsel %vm185_vm0, %v182_v48, %v184_v49 }
  0x97   :  { %v187_v51 = vrot.slane %v186_v50, 4 }
  0x99   :  { %vm188_vm1 = vcmp.lt.s32.totalorder %v186_v50, %v187_v51 }
  0x9a   :  { %v189_v52 = vsel %vm188_vm1, %v186_v50, %v187_v51 }
  0x9b   :  { %v190_v53 = vrot.slane %v189_v52, 2 }
  0x9d   :  { %vm191_vm2 = vcmp.lt.s32.totalorder %v189_v52, %v190_v53 }
  0x9e   :  { %v192_v54 = vsel %vm191_vm2, %v189_v52, %v190_v53 }
  0x9f   :  { %v193_v55 = vrot.slane %v192_v54, 1 }
  0xa1   :  { %vm194_vm3 = vcmp.lt.s32.totalorder %v192_v54, %v193_v55 }
  0xa2   :  { %v195_v60 = vsel %vm194_vm3, %v192_v54, %v193_v55 }
  0xa3   :  { %vm196_vm4 = vcmp.eq.s32.totalorder %v306_v11, %v195_v60  ;;  %vm197_vm5 = vcmp.eq.s32.totalorder %v309_v14, %v195_v60  ;;  %vm198_vm6 = vcmp.eq.s32.totalorder %v312_v15, %v195_v60  ;;  %vm199_vm10 = vcmp.eq.s32.totalorder %v315_v16, %v195_v60 }
  0xa4   :  { %v200_v61 = vsel %vm196_vm4, 0.0, %v160_v56  ;;  %v201_v62 = vsel %vm197_vm5, 0.0, %v161_v57  ;;  %v202_v63 = vsel %vm198_vm6, 0.0, %v162_v58  ;;  %v203_v0 = vsel %vm199_vm10, 0.0, %v163_v59 }
  0xa5   :  { %204 = vst [vmem:[#allocation5] sm:$0xff] %v200_v61  ;;  %205 = vst [vmem:[#allocation5 + $0x8] sm:$0xff] %v201_v62 }
  0xa6   :  { %206 = vst [vmem:[#allocation5 + $0x10] sm:$0xff] %v202_v63  ;;  %207 = vst [vmem:[#allocation5 + $0x18] sm:$0xff] %v203_v0 }
  0xa7   :  { %262 = shalt.err (!%p259_p12)
}
  0xa8   :  { %s263_s24 = scalar_lea.hbm %s393_s1, 512 }
  0xa9   :  { %p264_p13 = scmp.ne.s32.totalorder %s393_s1, %s263_s24  ;;  %p267_p0 = scmp.lt.u32.totalorder %s263_s24, %s393_s1 }
  0xab   :  { %p269_p1 = pnand %p267_p0, %p264_p13 }
  0xad   :  { %272 = shalt.err (!%p269_p1)
}
  0xae   :  { %219 = dma.vmem_to_hbm [thread:$0]  %s214_s20, 512, %s393_s1, [#allocation4], %s278_s16, %s278_s16, %s279_s17  }
  0xaf   :  { %275 = dma.done.wait [#allocation4], 512  }
  0xb0   :  { %276 = vsyncadd [#allocation4], 4294966784 }
  0xb1   :  { %223 = vsyncpa [#allocation3], 1 }
  0xb2   :  { %224 = vsyncpa [#allocation4], 1 }

</bundles_post_ra>
